<compile_context>
chip_gen: v5e
topology: v5e:2x2
jax: 0.10.0
libtpu: 0.0.40
codegen_flags: <defaults>
</compile_context>

<pallas_src>
import numpy as np

import jax
import jax.numpy as jnp
from jax.experimental import pallas as pl
from jax.experimental.pallas import tpu as pltpu


# ---------------------------------------------------------------------------
# Test-only tiled identity kernel (validates pallas_call plumbing on TPU).
# ---------------------------------------------------------------------------
def _copy_kernel(x_ref, o_ref):
    o_ref[...] = x_ref[...]


def _pick_tile(dim: int, target: int, quantum: int) -> int:
    """Largest multiple of `quantum` that divides `dim` and is <= `target`;
    falls back to the full dim (which always satisfies the (8,128) rule)."""
    t = min(target, dim)
    t -= t % quantum
    while t >= quantum:
        if dim % t == 0:
            return t
        t -= quantum
    return dim


def pallas_identity(x: jax.Array, *, donate: bool = False) -> jax.Array:
    """Identity implemented as a tiled, pipelined Pallas TPU kernel.

    Test-only utility (JamNet itself has no compute).  If `donate=True` the
    input buffer is aliased to the output (no extra HBM allocation) and the
    caller MUST NOT reuse `x` afterwards.
    """
    assert x.ndim == 2, "demo kernel expects a 2-D array"
    rows, cols = x.shape
    itemsize = jnp.dtype(x.dtype).itemsize

    # Sub-32-bit dtypes pack along sublanes: f32 -> 8, bf16 -> 16, int8/fp8 -> 32.
    sublane_q = 8 * max(1, 4 // itemsize)
    lane_q = 128

    total_bytes = rows * cols * itemsize
    single_block_cutoff = 4 << 20   # small inputs: one full-array block
    tile_budget = 4 << 20           # <= 4 MiB/tile keeps double-buffered
                                    # operands well inside v7x's 64 MiB VMEM

    if total_bytes <= single_block_cutoff:
        tr, tc = rows, cols
    else:
        # Lane-dense column tile (multiple of 128; fallback = full cols).
        tc = _pick_tile(cols, max(lane_q, min(cols, 2048)), lane_q)
        # Row tile sized so the tile fits the per-tile VMEM budget.
        row_target = max(sublane_q, tile_budget // max(1, tc * itemsize))
        tr = _pick_tile(rows, min(row_target, 1024), sublane_q)

    tile_bytes = tr * tc * itemsize
    # 2 operands x 2 pipeline buffers, plus ~2x headroom; never below 16 MiB.
    vmem_limit = max(16 << 20, int(tile_bytes * 4 * 2))

    grid = (pl.cdiv(rows, tr), pl.cdiv(cols, tc))

    return pl.pallas_call(
        _copy_kernel,
        out_shape=jax.ShapeDtypeStruct(x.shape, x.dtype),
        grid=grid,
        in_specs=[pl.BlockSpec((tr, tc), lambda i, j: (i, j))],
        out_specs=pl.BlockSpec((tr, tc), lambda i, j: (i, j)),
        input_output_aliases=({0: 0} if donate else {}),
        compiler_params=pltpu.CompilerParams(
            dimension_semantics=("parallel", "parallel"),
            vmem_limit_bytes=vmem_limit,
        ),
    )(x)


# ---------------------------------------------------------------------------
# JamNet equivalent — no parameters, no compute, no pallas_call on this path.
# ---------------------------------------------------------------------------
class JamNet:
    """JAX mirror of the (empty) PyTorch JamNet module."""

    def __init__(self):
        # Reference __init__ defines no parameters.
        pass

    def forward(self):
        # Reference forward() takes no inputs and returns None.
        return None

    __call__ = forward


if __name__ == "__main__":
    # Exercise the (empty) module exactly as PyTorch would.
    model = JamNet()
    assert model.forward() is None  # matches `def forward(self): pass`
    assert model() is None

    key_small, key_big = jax.random.split(jax.random.PRNGKey(0))

    # --- small input: single full-array block (no grid overhead) ----------
    x_small = jax.random.normal(key_small, (1024, 256), dtype=jnp.float32)  # 1 MiB
    y_small = pallas_identity(x_small)                 # no donation (default)
    jax.block_until_ready(y_small)
    assert y_small.shape == x_small.shape and y_small.dtype == x_small.dtype
    assert np.allclose(np.asarray(jax.device_get(y_small)),
                       np.asarray(jax.device_get(x_small)))

    # --- larger input: tiled, pipelined, aliased (donated) path ------------
    x_big = jax.random.normal(key_big, (2048, 768), dtype=jnp.float32)      # 6 MiB
    x_big_host = np.asarray(jax.device_get(x_big))     # snapshot BEFORE donation
    y_big = pallas_identity(x_big, donate=True)        # x_big is donated here
    jax.block_until_ready(y_big)
    assert y_big.shape == x_big_host.shape and y_big.dtype == jnp.float32
    assert np.allclose(np.asarray(jax.device_get(y_big)), x_big_host)

    print("KERNEL_OK")
</pallas_src>

<mosaic_0001>
module attributes {stable_mosaic.version = 11 : i64} {
  func.func @_copy_kernel(%arg0: i32, %arg1: i32, %arg2: memref<1024x256xf32, #tpu.memory_space<vmem>>, %arg3: memref<1024x256xf32, #tpu.memory_space<vmem>>) attributes {dimension_semantics = [#tpu.dimension_semantics<parallel>, #tpu.dimension_semantics<parallel>], iteration_bounds = array<i64: 1, 1>, scalar_prefetch = 0 : i64, scratch_operands = 0 : i64, tpu.core_type = #tpu.core_type<tc>, window_params = [{transform_indices = @transform_0, window_bounds = array<i64: 1024, 256>}, {transform_indices = @transform_1, window_bounds = array<i64: 1024, 256>}]} {
    %c0 = arith.constant 0 : index
    %c0_0 = arith.constant 0 : index
    %0 = vector.load %arg2[%c0, %c0_0] : memref<1024x256xf32, #tpu.memory_space<vmem>>, vector<1024x256xf32>
    %c0_1 = arith.constant 0 : index
    %c0_2 = arith.constant 0 : index
    %1 = vector.load %arg3[%c0_1, %c0_2] : memref<1024x256xf32, #tpu.memory_space<vmem>>, vector<1024x256xf32>
    tpu.vector_store %arg3[%c0_1, %c0_2], %0 {strides = array<i32>} : memref<1024x256xf32, #tpu.memory_space<vmem>>, vector<1024x256xf32>,
    return
  }
  func.func @transform_0(%arg0: i32, %arg1: i32) -> (i32, i32) {
    %c0_i32 = arith.constant 0 : i32
    return %arg0, %arg1 : i32, i32
  }
  func.func @transform_1(%arg0: i32, %arg1: i32) -> (i32, i32) {
    %c0_i32 = arith.constant 0 : i32
    return %arg0, %arg1 : i32, i32
  }
}

</mosaic_0001>

<bundles_post_ra>
// kernel: tpu_custom_call.1
= control target key start
LH: loop header
LB: loop body
LE: loop exit
PB: predicated region body
PF: predicated region fallthrough
CT: control target
= control target key end

     0   :  { %6 = vsyncpa [#allocation3], 0  ;;  %s638_s0 = inlined_call_operand.hbm [shape: f32[1024,256], index: 0, kind: input, shape index: {}]   ;;  %s639_s1 = inlined_call_operand.hbm [shape: f32[1024,256], index: 1, kind: output, shape index: {}]  }
   0x1   :  { %7 = vsyncpa [#allocation4], 0  ;;  %s12_s8 = sshll.u32 %s638_s0, 4  ;;  %s612_s9 = smov [#allocation2]   ;;  %s13_s8 = int_to_ptr.hbm [resolvable:$true] %s12_s8 }
   0x2   :  { %s14_s10 = sshll.u32 %s612_s9, 4  ;;  %s613_s11 = smov 256   ;;  %s15_s10 = int_to_ptr.vmem [resolvable:$true] %s14_s10 }
   0x3   :  { %s614_s12 = smov 16  }
   0x4   :  { %20 = dma.hbm_to_vmem [thread:$0]  %s13_s8, 32768, %s15_s10, [#allocation3], %s613_s11, %s613_s11, %s614_s12  }
   0x5   :  { %608 = dma.done.wait [#allocation3], 32768  }
   0x6   :  { %609 = vsyncadd [#allocation3], 4294934528  ;;  %v25_v0 = vld [vmem:[#allocation2] sm:$0xff]  ;;  %v26_v1 = vld [vmem:[#allocation2 + $0x8] sm:$0xff]  ;;  %s615_s0 = smov [#allocation5]   ;;  %s543_s16 = sshll.u32 %s639_s1, 4  ;;  %s544_s16 = int_to_ptr.hbm [resolvable:$true] %s543_s16 }
   0x7   :  { %v27_v2 = vld [vmem:[#allocation2 + $0x10] sm:$0xff]  ;;  %281 = vst [vmem:[#allocation5] sm:$0xff] %v25_v0  ;;  %v28_v3 = vld [vmem:[#allocation2 + $0x18] sm:$0xff]  ;;  %v29_v4 = vld [vmem:[#allocation2 + $0x20] sm:$0xff]  ;;  %s541_s13 = sshll.u32 %s615_s0, 4  ;;  %s542_s13 = int_to_ptr.vmem [resolvable:$true] %s541_s13 }
   0x8   :  { %282 = vst [vmem:[#allocation5 + $0x8] sm:$0xff] %v26_v1  ;;  %v30_v5 = vld [vmem:[#allocation2 + $0x28] sm:$0xff]  ;;  %v31_v6 = vld [vmem:[#allocation2 + $0x30] sm:$0xff]  ;;  %v32_v7 = vld [vmem:[#allocation2 + $0x38] sm:$0xff] }
   0x9   :  { %283 = vst [vmem:[#allocation5 + $0x10] sm:$0xff] %v27_v2  ;;  %v33_v8 = vld [vmem:[#allocation2 + $0x40] sm:$0xff]  ;;  %v34_v9 = vld [vmem:[#allocation2 + $0x48] sm:$0xff]  ;;  %v35_v10 = vld [vmem:[#allocation2 + $0x50] sm:$0xff] }
   0xa   :  { %284 = vst [vmem:[#allocation5 + $0x18] sm:$0xff] %v28_v3  ;;  %v36_v11 = vld [vmem:[#allocation2 + $0x58] sm:$0xff]  ;;  %v37_v12 = vld [vmem:[#allocation2 + $0x60] sm:$0xff]  ;;  %v38_v13 = vld [vmem:[#allocation2 + $0x68] sm:$0xff] }
   0xb   :  { %285 = vst [vmem:[#allocation5 + $0x20] sm:$0xff] %v29_v4  ;;  %v39_v14 = vld [vmem:[#allocation2 + $0x70] sm:$0xff]  ;;  %v40_v15 = vld [vmem:[#allocation2 + $0x78] sm:$0xff]  ;;  %v41_v16 = vld [vmem:[#allocation2 + $0x80] sm:$0xff] }
   0xc   :  { %286 = vst [vmem:[#allocation5 + $0x28] sm:$0xff] %v30_v5  ;;  %v42_v17 = vld [vmem:[#allocation2 + $0x88] sm:$0xff]  ;;  %v43_v18 = vld [vmem:[#allocation2 + $0x90] sm:$0xff]  ;;  %v44_v19 = vld [vmem:[#allocation2 + $0x98] sm:$0xff] }
   0xd   :  { %287 = vst [vmem:[#allocation5 + $0x30] sm:$0xff] %v31_v6  ;;  %v45_v20 = vld [vmem:[#allocation2 + $0xa0] sm:$0xff]  ;;  %v46_v21 = vld [vmem:[#allocation2 + $0xa8] sm:$0xff]  ;;  %v47_v22 = vld [vmem:[#allocation2 + $0xb0] sm:$0xff] }
   0xe   :  { %288 = vst [vmem:[#allocation5 + $0x38] sm:$0xff] %v32_v7  ;;  %v48_v23 = vld [vmem:[#allocation2 + $0xb8] sm:$0xff]  ;;  %v49_v24 = vld [vmem:[#allocation2 + $0xc0] sm:$0xff]  ;;  %v50_v25 = vld [vmem:[#allocation2 + $0xc8] sm:$0xff] }
   0xf   :  { %289 = vst [vmem:[#allocation5 + $0x40] sm:$0xff] %v33_v8  ;;  %v51_v26 = vld [vmem:[#allocation2 + $0xd0] sm:$0xff]  ;;  %v52_v27 = vld [vmem:[#allocation2 + $0xd8] sm:$0xff]  ;;  %v53_v28 = vld [vmem:[#allocation2 + $0xe0] sm:$0xff] }
  0x10   :  { %290 = vst [vmem:[#allocation5 + $0x48] sm:$0xff] %v34_v9  ;;  %v54_v29 = vld [vmem:[#allocation2 + $0xe8] sm:$0xff]  ;;  %v55_v30 = vld [vmem:[#allocation2 + $0xf0] sm:$0xff]  ;;  %v56_v31 = vld [vmem:[#allocation2 + $0xf8] sm:$0xff] }
  0x11   :  { %291 = vst [vmem:[#allocation5 + $0x50] sm:$0xff] %v35_v10  ;;  %v57_v32 = vld [vmem:[#allocation2 + $0x100] sm:$0xff]  ;;  %v58_v33 = vld [vmem:[#allocation2 + $0x108] sm:$0xff]  ;;  %v59_v34 = vld [vmem:[#allocation2 + $0x110] sm:$0xff] }
  0x12   :  { %292 = vst [vmem:[#allocation5 + $0x58] sm:$0xff] %v36_v11  ;;  %v60_v35 = vld [vmem:[#allocation2 + $0x118] sm:$0xff]  ;;  %v61_v36 = vld [vmem:[#allocation2 + $0x120] sm:$0xff]  ;;  %v62_v37 = vld [vmem:[#allocation2 + $0x128] sm:$0xff] }
  0x13   :  { %293 = vst [vmem:[#allocation5 + $0x60] sm:$0xff] %v37_v12  ;;  %v63_v38 = vld [vmem:[#allocation2 + $0x130] sm:$0xff]  ;;  %v64_v39 = vld [vmem:[#allocation2 + $0x138] sm:$0xff]  ;;  %v65_v40 = vld [vmem:[#allocation2 + $0x140] sm:$0xff] }
  0x14   :  { %294 = vst [vmem:[#allocation5 + $0x68] sm:$0xff] %v38_v13  ;;  %v66_v41 = vld [vmem:[#allocation2 + $0x148] sm:$0xff]  ;;  %v67_v42 = vld [vmem:[#allocation2 + $0x150] sm:$0xff]  ;;  %v68_v43 = vld [vmem:[#allocation2 + $0x158] sm:$0xff] }
  0x15   :  { %295 = vst [vmem:[#allocation5 + $0x70] sm:$0xff] %v39_v14  ;;  %v69_v44 = vld [vmem:[#allocation2 + $0x160] sm:$0xff]  ;;  %v70_v45 = vld [vmem:[#allocation2 + $0x168] sm:$0xff]  ;;  %v71_v46 = vld [vmem:[#allocation2 + $0x170] sm:$0xff] }
  0x16   :  { %296 = vst [vmem:[#allocation5 + $0x78] sm:$0xff] %v40_v15  ;;  %v72_v47 = vld [vmem:[#allocation2 + $0x178] sm:$0xff]  ;;  %v73_v48 = vld [vmem:[#allocation2 + $0x180] sm:$0xff]  ;;  %v74_v49 = vld [vmem:[#allocation2 + $0x188] sm:$0xff] }
  0x17   :  { %297 = vst [vmem:[#allocation5 + $0x80] sm:$0xff] %v41_v16  ;;  %v75_v50 = vld [vmem:[#allocation2 + $0x190] sm:$0xff]  ;;  %v76_v51 = vld [vmem:[#allocation2 + $0x198] sm:$0xff]  ;;  %v77_v52 = vld [vmem:[#allocation2 + $0x1a0] sm:$0xff] }
  0x18   :  { %298 = vst [vmem:[#allocation5 + $0x88] sm:$0xff] %v42_v17  ;;  %v78_v53 = vld [vmem:[#allocation2 + $0x1a8] sm:$0xff]  ;;  %v79_v54 = vld [vmem:[#allocation2 + $0x1b0] sm:$0xff]  ;;  %v80_v55 = vld [vmem:[#allocation2 + $0x1b8] sm:$0xff] }
  0x19   :  { %299 = vst [vmem:[#allocation5 + $0x90] sm:$0xff] %v43_v18  ;;  %v81_v56 = vld [vmem:[#allocation2 + $0x1c0] sm:$0xff]  ;;  %v82_v57 = vld [vmem:[#allocation2 + $0x1c8] sm:$0xff]  ;;  %v83_v58 = vld [vmem:[#allocation2 + $0x1d0] sm:$0xff] }
  0x1a   :  { %300 = vst [vmem:[#allocation5 + $0x98] sm:$0xff] %v44_v19  ;;  %v84_v59 = vld [vmem:[#allocation2 + $0x1d8] sm:$0xff]  ;;  %v85_v60 = vld [vmem:[#allocation2 + $0x1e0] sm:$0xff]  ;;  %v86_v61 = vld [vmem:[#allocation2 + $0x1e8] sm:$0xff] }
  0x1b   :  { %301 = vst [vmem:[#allocation5 + $0xa0] sm:$0xff] %v45_v20  ;;  %v87_v62 = vld [vmem:[#allocation2 + $0x1f0] sm:$0xff]  ;;  %v88_v63 = vld [vmem:[#allocation2 + $0x1f8] sm:$0xff]  ;;  %v89_v0 = vld [vmem:[#allocation2 + $0x200] sm:$0xff] }
  0x1c   :  { %302 = vst [vmem:[#allocation5 + $0xa8] sm:$0xff] %v46_v21  ;;  %v90_v1 = vld [vmem:[#allocation2 + $0x208] sm:$0xff]  ;;  %v91_v2 = vld [vmem:[#allocation2 + $0x210] sm:$0xff]  ;;  %v92_v3 = vld [vmem:[#allocation2 + $0x218] sm:$0xff] }
  0x1d   :  { %303 = vst [vmem:[#allocation5 + $0xb0] sm:$0xff] %v47_v22  ;;  %v93_v4 = vld [vmem:[#allocation2 + $0x220] sm:$0xff]  ;;  %v94_v5 = vld [vmem:[#allocation2 + $0x228] sm:$0xff]  ;;  %v95_v6 = vld [vmem:[#allocation2 + $0x230] sm:$0xff] }
  0x1e   :  { %304 = vst [vmem:[#allocation5 + $0xb8] sm:$0xff] %v48_v23  ;;  %v96_v7 = vld [vmem:[#allocation2 + $0x238] sm:$0xff]  ;;  %v97_v8 = vld [vmem:[#allocation2 + $0x240] sm:$0xff]  ;;  %v98_v9 = vld [vmem:[#allocation2 + $0x248] sm:$0xff] }
  0x1f   :  { %305 = vst [vmem:[#allocation5 + $0xc0] sm:$0xff] %v49_v24  ;;  %v99_v10 = vld [vmem:[#allocation2 + $0x250] sm:$0xff]  ;;  %v100_v11 = vld [vmem:[#allocation2 + $0x258] sm:$0xff]  ;;  %v101_v12 = vld [vmem:[#allocation2 + $0x260] sm:$0xff] }
  0x20   :  { %306 = vst [vmem:[#allocation5 + $0xc8] sm:$0xff] %v50_v25  ;;  %v102_v13 = vld [vmem:[#allocation2 + $0x268] sm:$0xff]  ;;  %v103_v14 = vld [vmem:[#allocation2 + $0x270] sm:$0xff]  ;;  %v104_v15 = vld [vmem:[#allocation2 + $0x278] sm:$0xff] }
  0x21   :  { %307 = vst [vmem:[#allocation5 + $0xd0] sm:$0xff] %v51_v26  ;;  %v105_v16 = vld [vmem:[#allocation2 + $0x280] sm:$0xff]  ;;  %v106_v17 = vld [vmem:[#allocation2 + $0x288] sm:$0xff]  ;;  %v107_v18 = vld [vmem:[#allocation2 + $0x290] sm:$0xff] }
  0x22   :  { %308 = vst [vmem:[#allocation5 + $0xd8] sm:$0xff] %v52_v27  ;;  %v108_v19 = vld [vmem:[#allocation2 + $0x298] sm:$0xff]  ;;  %v109_v20 = vld [vmem:[#allocation2 + $0x2a0] sm:$0xff]  ;;  %v110_v21 = vld [vmem:[#allocation2 + $0x2a8] sm:$0xff] }
  0x23   :  { %309 = vst [vmem:[#allocation5 + $0xe0] sm:$0xff] %v53_v28  ;;  %v111_v22 = vld [vmem:[#allocation2 + $0x2b0] sm:$0xff]  ;;  %v112_v23 = vld [vmem:[#allocation2 + $0x2b8] sm:$0xff]  ;;  %v113_v24 = vld [vmem:[#allocation2 + $0x2c0] sm:$0xff] }
  0x24   :  { %310 = vst [vmem:[#allocation5 + $0xe8] sm:$0xff] %v54_v29  ;;  %v114_v25 = vld [vmem:[#allocation2 + $0x2c8] sm:$0xff]  ;;  %v115_v26 = vld [vmem:[#allocation2 + $0x2d0] sm:$0xff]  ;;  %v116_v27 = vld [vmem:[#allocation2 + $0x2d8] sm:$0xff] }
  0x25   :  { %311 = vst [vmem:[#allocation5 + $0xf0] sm:$0xff] %v55_v30  ;;  %v117_v28 = vld [vmem:[#allocation2 + $0x2e0] sm:$0xff]  ;;  %v118_v29 = vld [vmem:[#allocation2 + $0x2e8] sm:$0xff]  ;;  %v119_v30 = vld [vmem:[#allocation2 + $0x2f0] sm:$0xff] }
  0x26   :  { %312 = vst [vmem:[#allocation5 + $0xf8] sm:$0xff] %v56_v31  ;;  %v120_v31 = vld [vmem:[#allocation2 + $0x2f8] sm:$0xff] }
  0x27   :  { %313 = vst [vmem:[#allocation5 + $0x100] sm:$0xff] %v57_v32  ;;  %v121_v32 = vld [vmem:[#allocation2 + $0x300] sm:$0xff] }
  0x28   :  { %314 = vst [vmem:[#allocation5 + $0x108] sm:$0xff] %v58_v33  ;;  %v122_v33 = vld [vmem:[#allocation2 + $0x308] sm:$0xff] }
  0x29   :  { %315 = vst [vmem:[#allocation5 + $0x110] sm:$0xff] %v59_v34  ;;  %v123_v34 = vld [vmem:[#allocation2 + $0x310] sm:$0xff] }
  0x2a   :  { %316 = vst [vmem:[#allocation5 + $0x118] sm:$0xff] %v60_v35  ;;  %v124_v35 = vld [vmem:[#allocation2 + $0x318] sm:$0xff] }
  0x2b   :  { %317 = vst [vmem:[#allocation5 + $0x120] sm:$0xff] %v61_v36  ;;  %v125_v36 = vld [vmem:[#allocation2 + $0x320] sm:$0xff] }
  0x2c   :  { %318 = vst [vmem:[#allocation5 + $0x128] sm:$0xff] %v62_v37  ;;  %v126_v37 = vld [vmem:[#allocation2 + $0x328] sm:$0xff] }
  0x2d   :  { %319 = vst [vmem:[#allocation5 + $0x130] sm:$0xff] %v63_v38  ;;  %v127_v38 = vld [vmem:[#allocation2 + $0x330] sm:$0xff] }
  0x2e   :  { %320 = vst [vmem:[#allocation5 + $0x138] sm:$0xff] %v64_v39  ;;  %v128_v39 = vld [vmem:[#allocation2 + $0x338] sm:$0xff] }
  0x2f   :  { %321 = vst [vmem:[#allocation5 + $0x140] sm:$0xff] %v65_v40  ;;  %v129_v40 = vld [vmem:[#allocation2 + $0x340] sm:$0xff] }
  0x30   :  { %322 = vst [vmem:[#allocation5 + $0x148] sm:$0xff] %v66_v41  ;;  %v130_v41 = vld [vmem:[#allocation2 + $0x348] sm:$0xff] }
  0x31   :  { %323 = vst [vmem:[#allocation5 + $0x150] sm:$0xff] %v67_v42  ;;  %v131_v42 = vld [vmem:[#allocation2 + $0x350] sm:$0xff] }
  0x32   :  { %324 = vst [vmem:[#allocation5 + $0x158] sm:$0xff] %v68_v43  ;;  %v132_v43 = vld [vmem:[#allocation2 + $0x358] sm:$0xff] }
  0x33   :  { %325 = vst [vmem:[#allocation5 + $0x160] sm:$0xff] %v69_v44  ;;  %v133_v44 = vld [vmem:[#allocation2 + $0x360] sm:$0xff] }
  0x34   :  { %326 = vst [vmem:[#allocation5 + $0x168] sm:$0xff] %v70_v45  ;;  %v134_v45 = vld [vmem:[#allocation2 + $0x368] sm:$0xff] }
  0x35   :  { %327 = vst [vmem:[#allocation5 + $0x170] sm:$0xff] %v71_v46  ;;  %v135_v46 = vld [vmem:[#allocation2 + $0x370] sm:$0xff] }
  0x36   :  { %328 = vst [vmem:[#allocation5 + $0x178] sm:$0xff] %v72_v47  ;;  %v136_v47 = vld [vmem:[#allocation2 + $0x378] sm:$0xff] }
  0x37   :  { %329 = vst [vmem:[#allocation5 + $0x180] sm:$0xff] %v73_v48  ;;  %v137_v48 = vld [vmem:[#allocation2 + $0x380] sm:$0xff] }
  0x38   :  { %330 = vst [vmem:[#allocation5 + $0x188] sm:$0xff] %v74_v49  ;;  %v138_v49 = vld [vmem:[#allocation2 + $0x388] sm:$0xff] }
  0x39   :  { %331 = vst [vmem:[#allocation5 + $0x190] sm:$0xff] %v75_v50  ;;  %v139_v50 = vld [vmem:[#allocation2 + $0x390] sm:$0xff] }
  0x3a   :  { %332 = vst [vmem:[#allocation5 + $0x198] sm:$0xff] %v76_v51  ;;  %v140_v51 = vld [vmem:[#allocation2 + $0x398] sm:$0xff] }
  0x3b   :  { %333 = vst [vmem:[#allocation5 + $0x1a0] sm:$0xff] %v77_v52  ;;  %v141_v52 = vld [vmem:[#allocation2 + $0x3a0] sm:$0xff] }
  0x3c   :  { %334 = vst [vmem:[#allocation5 + $0x1a8] sm:$0xff] %v78_v53  ;;  %v142_v53 = vld [vmem:[#allocation2 + $0x3a8] sm:$0xff] }
  0x3d   :  { %335 = vst [vmem:[#allocation5 + $0x1b0] sm:$0xff] %v79_v54  ;;  %v143_v54 = vld [vmem:[#allocation2 + $0x3b0] sm:$0xff] }
  0x3e   :  { %336 = vst [vmem:[#allocation5 + $0x1b8] sm:$0xff] %v80_v55  ;;  %v144_v55 = vld [vmem:[#allocation2 + $0x3b8] sm:$0xff] }
  0x3f   :  { %337 = vst [vmem:[#allocation5 + $0x1c0] sm:$0xff] %v81_v56  ;;  %v145_v56 = vld [vmem:[#allocation2 + $0x3c0] sm:$0xff] }
  0x40   :  { %338 = vst [vmem:[#allocation5 + $0x1c8] sm:$0xff] %v82_v57  ;;  %v146_v57 = vld [vmem:[#allocation2 + $0x3c8] sm:$0xff] }
  0x41   :  { %339 = vst [vmem:[#allocation5 + $0x1d0] sm:$0xff] %v83_v58  ;;  %v147_v58 = vld [vmem:[#allocation2 + $0x3d0] sm:$0xff] }
  0x42   :  { %340 = vst [vmem:[#allocation5 + $0x1d8] sm:$0xff] %v84_v59  ;;  %v148_v59 = vld [vmem:[#allocation2 + $0x3d8] sm:$0xff] }
  0x43   :  { %341 = vst [vmem:[#allocation5 + $0x1e0] sm:$0xff] %v85_v60  ;;  %v149_v60 = vld [vmem:[#allocation2 + $0x3e0] sm:$0xff] }
  0x44   :  { %342 = vst [vmem:[#allocation5 + $0x1e8] sm:$0xff] %v86_v61  ;;  %v150_v61 = vld [vmem:[#allocation2 + $0x3e8] sm:$0xff] }
  0x45   :  { %343 = vst [vmem:[#allocation5 + $0x1f0] sm:$0xff] %v87_v62  ;;  %v151_v62 = vld [vmem:[#allocation2 + $0x3f0] sm:$0xff] }
  0x46   :  { %344 = vst [vmem:[#allocation5 + $0x1f8] sm:$0xff] %v88_v63  ;;  %v152_v63 = vld [vmem:[#allocation2 + $0x3f8] sm:$0xff] }
  0x47   :  { %345 = vst [vmem:[#allocation5 + $0x200] sm:$0xff] %v89_v0  ;;  %v153_v0 = vld [vmem:[#allocation2 + $0x400] sm:$0xff] }
  0x48   :  { %346 = vst [vmem:[#allocation5 + $0x208] sm:$0xff] %v90_v1  ;;  %v154_v1 = vld [vmem:[#allocation2 + $0x408] sm:$0xff] }
  0x49   :  { %347 = vst [vmem:[#allocation5 + $0x210] sm:$0xff] %v91_v2  ;;  %v155_v2 = vld [vmem:[#allocation2 + $0x410] sm:$0xff] }
  0x4a   :  { %348 = vst [vmem:[#allocation5 + $0x218] sm:$0xff] %v92_v3  ;;  %v156_v3 = vld [vmem:[#allocation2 + $0x418] sm:$0xff] }
  0x4b   :  { %349 = vst [vmem:[#allocation5 + $0x220] sm:$0xff] %v93_v4  ;;  %v157_v4 = vld [vmem:[#allocation2 + $0x420] sm:$0xff] }
  0x4c   :  { %350 = vst [vmem:[#allocation5 + $0x228] sm:$0xff] %v94_v5  ;;  %v158_v5 = vld [vmem:[#allocation2 + $0x428] sm:$0xff] }
  0x4d   :  { %351 = vst [vmem:[#allocation5 + $0x230] sm:$0xff] %v95_v6  ;;  %v159_v6 = vld [vmem:[#allocation2 + $0x430] sm:$0xff] }
  0x4e   :  { %352 = vst [vmem:[#allocation5 + $0x238] sm:$0xff] %v96_v7  ;;  %v160_v7 = vld [vmem:[#allocation2 + $0x438] sm:$0xff] }
  0x4f   :  { %353 = vst [vmem:[#allocation5 + $0x240] sm:$0xff] %v97_v8  ;;  %v161_v8 = vld [vmem:[#allocation2 + $0x440] sm:$0xff] }
  0x50   :  { %354 = vst [vmem:[#allocation5 + $0x248] sm:$0xff] %v98_v9  ;;  %v162_v9 = vld [vmem:[#allocation2 + $0x448] sm:$0xff] }
  0x51   :  { %355 = vst [vmem:[#allocation5 + $0x250] sm:$0xff] %v99_v10  ;;  %v163_v10 = vld [vmem:[#allocation2 + $0x450] sm:$0xff] }
  0x52   :  { %356 = vst [vmem:[#allocation5 + $0x258] sm:$0xff] %v100_v11  ;;  %v164_v11 = vld [vmem:[#allocation2 + $0x458] sm:$0xff] }
  0x53   :  { %357 = vst [vmem:[#allocation5 + $0x260] sm:$0xff] %v101_v12  ;;  %v165_v12 = vld [vmem:[#allocation2 + $0x460] sm:$0xff] }
  0x54   :  { %358 = vst [vmem:[#allocation5 + $0x268] sm:$0xff] %v102_v13  ;;  %v166_v13 = vld [vmem:[#allocation2 + $0x468] sm:$0xff] }
  0x55   :  { %359 = vst [vmem:[#allocation5 + $0x270] sm:$0xff] %v103_v14  ;;  %v167_v14 = vld [vmem:[#allocation2 + $0x470] sm:$0xff] }
  0x56   :  { %360 = vst [vmem:[#allocation5 + $0x278] sm:$0xff] %v104_v15  ;;  %v168_v15 = vld [vmem:[#allocation2 + $0x478] sm:$0xff] }
  0x57   :  { %361 = vst [vmem:[#allocation5 + $0x280] sm:$0xff] %v105_v16  ;;  %v169_v16 = vld [vmem:[#allocation2 + $0x480] sm:$0xff] }
  0x58   :  { %362 = vst [vmem:[#allocation5 + $0x288] sm:$0xff] %v106_v17  ;;  %v170_v17 = vld [vmem:[#allocation2 + $0x488] sm:$0xff] }
  0x59   :  { %363 = vst [vmem:[#allocation5 + $0x290] sm:$0xff] %v107_v18  ;;  %v171_v18 = vld [vmem:[#allocation2 + $0x490] sm:$0xff] }
  0x5a   :  { %364 = vst [vmem:[#allocation5 + $0x298] sm:$0xff] %v108_v19  ;;  %v172_v19 = vld [vmem:[#allocation2 + $0x498] sm:$0xff] }
  0x5b   :  { %365 = vst [vmem:[#allocation5 + $0x2a0] sm:$0xff] %v109_v20  ;;  %v173_v20 = vld [vmem:[#allocation2 + $0x4a0] sm:$0xff] }
  0x5c   :  { %366 = vst [vmem:[#allocation5 + $0x2a8] sm:$0xff] %v110_v21  ;;  %v174_v21 = vld [vmem:[#allocation2 + $0x4a8] sm:$0xff] }
  0x5d   :  { %367 = vst [vmem:[#allocation5 + $0x2b0] sm:$0xff] %v111_v22  ;;  %v175_v22 = vld [vmem:[#allocation2 + $0x4b0] sm:$0xff] }
  0x5e   :  { %368 = vst [vmem:[#allocation5 + $0x2b8] sm:$0xff] %v112_v23  ;;  %v176_v23 = vld [vmem:[#allocation2 + $0x4b8] sm:$0xff] }
  0x5f   :  { %369 = vst [vmem:[#allocation5 + $0x2c0] sm:$0xff] %v113_v24  ;;  %v177_v24 = vld [vmem:[#allocation2 + $0x4c0] sm:$0xff] }
  0x60   :  { %370 = vst [vmem:[#allocation5 + $0x2c8] sm:$0xff] %v114_v25  ;;  %v178_v25 = vld [vmem:[#allocation2 + $0x4c8] sm:$0xff] }
  0x61   :  { %371 = vst [vmem:[#allocation5 + $0x2d0] sm:$0xff] %v115_v26  ;;  %v179_v26 = vld [vmem:[#allocation2 + $0x4d0] sm:$0xff] }
  0x62   :  { %372 = vst [vmem:[#allocation5 + $0x2d8] sm:$0xff] %v116_v27  ;;  %v180_v27 = vld [vmem:[#allocation2 + $0x4d8] sm:$0xff] }
  0x63   :  { %373 = vst [vmem:[#allocation5 + $0x2e0] sm:$0xff] %v117_v28  ;;  %v181_v28 = vld [vmem:[#allocation2 + $0x4e0] sm:$0xff] }
  0x64   :  { %374 = vst [vmem:[#allocation5 + $0x2e8] sm:$0xff] %v118_v29  ;;  %v182_v29 = vld [vmem:[#allocation2 + $0x4e8] sm:$0xff] }
  0x65   :  { %375 = vst [vmem:[#allocation5 + $0x2f0] sm:$0xff] %v119_v30  ;;  %v183_v30 = vld [vmem:[#allocation2 + $0x4f0] sm:$0xff] }
  0x66   :  { %376 = vst [vmem:[#allocation5 + $0x2f8] sm:$0xff] %v120_v31  ;;  %v184_v31 = vld [vmem:[#allocation2 + $0x4f8] sm:$0xff] }
  0x67   :  { %377 = vst [vmem:[#allocation5 + $0x300] sm:$0xff] %v121_v32  ;;  %v185_v32 = vld [vmem:[#allocation2 + $0x500] sm:$0xff] }
  0x68   :  { %378 = vst [vmem:[#allocation5 + $0x308] sm:$0xff] %v122_v33  ;;  %v186_v33 = vld [vmem:[#allocation2 + $0x508] sm:$0xff] }
  0x69   :  { %379 = vst [vmem:[#allocation5 + $0x310] sm:$0xff] %v123_v34  ;;  %v187_v34 = vld [vmem:[#allocation2 + $0x510] sm:$0xff] }
  0x6a   :  { %380 = vst [vmem:[#allocation5 + $0x318] sm:$0xff] %v124_v35  ;;  %v188_v35 = vld [vmem:[#allocation2 + $0x518] sm:$0xff] }
  0x6b   :  { %381 = vst [vmem:[#allocation5 + $0x320] sm:$0xff] %v125_v36  ;;  %v189_v36 = vld [vmem:[#allocation2 + $0x520] sm:$0xff] }
  0x6c   :  { %382 = vst [vmem:[#allocation5 + $0x328] sm:$0xff] %v126_v37  ;;  %v190_v37 = vld [vmem:[#allocation2 + $0x528] sm:$0xff] }
  0x6d   :  { %383 = vst [vmem:[#allocation5 + $0x330] sm:$0xff] %v127_v38  ;;  %v191_v38 = vld [vmem:[#allocation2 + $0x530] sm:$0xff] }
  0x6e   :  { %384 = vst [vmem:[#allocation5 + $0x338] sm:$0xff] %v128_v39  ;;  %v192_v39 = vld [vmem:[#allocation2 + $0x538] sm:$0xff] }
  0x6f   :  { %385 = vst [vmem:[#allocation5 + $0x340] sm:$0xff] %v129_v40  ;;  %v193_v40 = vld [vmem:[#allocation2 + $0x540] sm:$0xff] }
  0x70   :  { %386 = vst [vmem:[#allocation5 + $0x348] sm:$0xff] %v130_v41  ;;  %v194_v41 = vld [vmem:[#allocation2 + $0x548] sm:$0xff] }
  0x71   :  { %387 = vst [vmem:[#allocation5 + $0x350] sm:$0xff] %v131_v42  ;;  %v195_v42 = vld [vmem:[#allocation2 + $0x550] sm:$0xff] }
  0x72   :  { %388 = vst [vmem:[#allocation5 + $0x358] sm:$0xff] %v132_v43  ;;  %v196_v43 = vld [vmem:[#allocation2 + $0x558] sm:$0xff] }
  0x73   :  { %389 = vst [vmem:[#allocation5 + $0x360] sm:$0xff] %v133_v44  ;;  %v197_v44 = vld [vmem:[#allocation2 + $0x560] sm:$0xff] }
  0x74   :  { %390 = vst [vmem:[#allocation5 + $0x368] sm:$0xff] %v134_v45  ;;  %v198_v45 = vld [vmem:[#allocation2 + $0x568] sm:$0xff] }
  0x75   :  { %391 = vst [vmem:[#allocation5 + $0x370] sm:$0xff] %v135_v46  ;;  %v199_v46 = vld [vmem:[#allocation2 + $0x570] sm:$0xff] }
  0x76   :  { %392 = vst [vmem:[#allocation5 + $0x378] sm:$0xff] %v136_v47  ;;  %v200_v47 = vld [vmem:[#allocation2 + $0x578] sm:$0xff] }
  0x77   :  { %393 = vst [vmem:[#allocation5 + $0x380] sm:$0xff] %v137_v48  ;;  %v201_v48 = vld [vmem:[#allocation2 + $0x580] sm:$0xff] }
  0x78   :  { %394 = vst [vmem:[#allocation5 + $0x388] sm:$0xff] %v138_v49  ;;  %v202_v49 = vld [vmem:[#allocation2 + $0x588] sm:$0xff] }
  0x79   :  { %395 = vst [vmem:[#allocation5 + $0x390] sm:$0xff] %v139_v50  ;;  %v203_v50 = vld [vmem:[#allocation2 + $0x590] sm:$0xff] }
  0x7a   :  { %396 = vst [vmem:[#allocation5 + $0x398] sm:$0xff] %v140_v51  ;;  %v204_v51 = vld [vmem:[#allocation2 + $0x598] sm:$0xff] }
  0x7b   :  { %397 = vst [vmem:[#allocation5 + $0x3a0] sm:$0xff] %v141_v52  ;;  %v205_v52 = vld [vmem:[#allocation2 + $0x5a0] sm:$0xff] }
  0x7c   :  { %398 = vst [vmem:[#allocation5 + $0x3a8] sm:$0xff] %v142_v53  ;;  %v206_v53 = vld [vmem:[#allocation2 + $0x5a8] sm:$0xff] }
  0x7d   :  { %399 = vst [vmem:[#allocation5 + $0x3b0] sm:$0xff] %v143_v54  ;;  %v207_v54 = vld [vmem:[#allocation2 + $0x5b0] sm:$0xff] }
  0x7e   :  { %400 = vst [vmem:[#allocation5 + $0x3b8] sm:$0xff] %v144_v55  ;;  %v208_v55 = vld [vmem:[#allocation2 + $0x5b8] sm:$0xff] }
  0x7f   :  { %401 = vst [vmem:[#allocation5 + $0x3c0] sm:$0xff] %v145_v56  ;;  %v209_v56 = vld [vmem:[#allocation2 + $0x5c0] sm:$0xff] }
  0x80   :  { %402 = vst [vmem:[#allocation5 + $0x3c8] sm:$0xff] %v146_v57  ;;  %v210_v57 = vld [vmem:[#allocation2 + $0x5c8] sm:$0xff] }
  0x81   :  { %403 = vst [vmem:[#allocation5 + $0x3d0] sm:$0xff] %v147_v58  ;;  %v211_v58 = vld [vmem:[#allocation2 + $0x5d0] sm:$0xff] }
  0x82   :  { %404 = vst [vmem:[#allocation5 + $0x3d8] sm:$0xff] %v148_v59  ;;  %v212_v59 = vld [vmem:[#allocation2 + $0x5d8] sm:$0xff] }
  0x83   :  { %405 = vst [vmem:[#allocation5 + $0x3e0] sm:$0xff] %v149_v60  ;;  %v213_v60 = vld [vmem:[#allocation2 + $0x5e0] sm:$0xff] }
  0x84   :  { %406 = vst [vmem:[#allocation5 + $0x3e8] sm:$0xff] %v150_v61  ;;  %v214_v61 = vld [vmem:[#allocation2 + $0x5e8] sm:$0xff] }
  0x85   :  { %407 = vst [vmem:[#allocation5 + $0x3f0] sm:$0xff] %v151_v62  ;;  %v215_v62 = vld [vmem:[#allocation2 + $0x5f0] sm:$0xff] }
  0x86   :  { %408 = vst [vmem:[#allocation5 + $0x3f8] sm:$0xff] %v152_v63  ;;  %v216_v63 = vld [vmem:[#allocation2 + $0x5f8] sm:$0xff] }
  0x87   :  { %409 = vst [vmem:[#allocation5 + $0x400] sm:$0xff] %v153_v0  ;;  %v217_v0 = vld [vmem:[#allocation2 + $0x600] sm:$0xff] }
  0x88   :  { %410 = vst [vmem:[#allocation5 + $0x408] sm:$0xff] %v154_v1  ;;  %v218_v1 = vld [vmem:[#allocation2 + $0x608] sm:$0xff] }
  0x89   :  { %411 = vst [vmem:[#allocation5 + $0x410] sm:$0xff] %v155_v2  ;;  %v219_v2 = vld [vmem:[#allocation2 + $0x610] sm:$0xff] }
  0x8a   :  { %412 = vst [vmem:[#allocation5 + $0x418] sm:$0xff] %v156_v3  ;;  %v220_v3 = vld [vmem:[#allocation2 + $0x618] sm:$0xff] }
  0x8b   :  { %413 = vst [vmem:[#allocation5 + $0x420] sm:$0xff] %v157_v4  ;;  %v221_v4 = vld [vmem:[#allocation2 + $0x620] sm:$0xff] }
  0x8c   :  { %414 = vst [vmem:[#allocation5 + $0x428] sm:$0xff] %v158_v5  ;;  %v222_v5 = vld [vmem:[#allocation2 + $0x628] sm:$0xff] }
  0x8d   :  { %415 = vst [vmem:[#allocation5 + $0x430] sm:$0xff] %v159_v6  ;;  %v223_v6 = vld [vmem:[#allocation2 + $0x630] sm:$0xff] }
  0x8e   :  { %416 = vst [vmem:[#allocation5 + $0x438] sm:$0xff] %v160_v7  ;;  %v224_v7 = vld [vmem:[#allocation2 + $0x638] sm:$0xff] }
  0x8f   :  { %417 = vst [vmem:[#allocation5 + $0x440] sm:$0xff] %v161_v8  ;;  %v225_v8 = vld [vmem:[#allocation2 + $0x640] sm:$0xff] }
  0x90   :  { %418 = vst [vmem:[#allocation5 + $0x448] sm:$0xff] %v162_v9  ;;  %v226_v9 = vld [vmem:[#allocation2 + $0x648] sm:$0xff] }
  0x91   :  { %419 = vst [vmem:[#allocation5 + $0x450] sm:$0xff] %v163_v10  ;;  %v227_v10 = vld [vmem:[#allocation2 + $0x650] sm:$0xff] }
  0x92   :  { %420 = vst [vmem:[#allocation5 + $0x458] sm:$0xff] %v164_v11  ;;  %v228_v11 = vld [vmem:[#allocation2 + $0x658] sm:$0xff] }
  0x93   :  { %421 = vst [vmem:[#allocation5 + $0x460] sm:$0xff] %v165_v12  ;;  %v229_v12 = vld [vmem:[#allocation2 + $0x660] sm:$0xff] }
  0x94   :  { %422 = vst [vmem:[#allocation5 + $0x468] sm:$0xff] %v166_v13  ;;  %v230_v13 = vld [vmem:[#allocation2 + $0x668] sm:$0xff] }
  0x95   :  { %423 = vst [vmem:[#allocation5 + $0x470] sm:$0xff] %v167_v14  ;;  %v231_v14 = vld [vmem:[#allocation2 + $0x670] sm:$0xff] }
  0x96   :  { %424 = vst [vmem:[#allocation5 + $0x478] sm:$0xff] %v168_v15  ;;  %v232_v15 = vld [vmem:[#allocation2 + $0x678] sm:$0xff] }
  0x97   :  { %425 = vst [vmem:[#allocation5 + $0x480] sm:$0xff] %v169_v16  ;;  %v233_v16 = vld [vmem:[#allocation2 + $0x680] sm:$0xff] }
  0x98   :  { %426 = vst [vmem:[#allocation5 + $0x488] sm:$0xff] %v170_v17  ;;  %v234_v17 = vld [vmem:[#allocation2 + $0x688] sm:$0xff] }
  0x99   :  { %427 = vst [vmem:[#allocation5 + $0x490] sm:$0xff] %v171_v18  ;;  %v235_v18 = vld [vmem:[#allocation2 + $0x690] sm:$0xff] }
  0x9a   :  { %428 = vst [vmem:[#allocation5 + $0x498] sm:$0xff] %v172_v19  ;;  %v236_v19 = vld [vmem:[#allocation2 + $0x698] sm:$0xff] }
  0x9b   :  { %429 = vst [vmem:[#allocation5 + $0x4a0] sm:$0xff] %v173_v20  ;;  %v237_v20 = vld [vmem:[#allocation2 + $0x6a0] sm:$0xff] }
  0x9c   :  { %430 = vst [vmem:[#allocation5 + $0x4a8] sm:$0xff] %v174_v21  ;;  %v238_v21 = vld [vmem:[#allocation2 + $0x6a8] sm:$0xff] }
  0x9d   :  { %431 = vst [vmem:[#allocation5 + $0x4b0] sm:$0xff] %v175_v22  ;;  %v239_v22 = vld [vmem:[#allocation2 + $0x6b0] sm:$0xff] }
  0x9e   :  { %432 = vst [vmem:[#allocation5 + $0x4b8] sm:$0xff] %v176_v23  ;;  %v240_v23 = vld [vmem:[#allocation2 + $0x6b8] sm:$0xff] }
  0x9f   :  { %433 = vst [vmem:[#allocation5 + $0x4c0] sm:$0xff] %v177_v24  ;;  %v241_v24 = vld [vmem:[#allocation2 + $0x6c0] sm:$0xff] }
  0xa0   :  { %434 = vst [vmem:[#allocation5 + $0x4c8] sm:$0xff] %v178_v25  ;;  %v242_v25 = vld [vmem:[#allocation2 + $0x6c8] sm:$0xff] }
  0xa1   :  { %435 = vst [vmem:[#allocation5 + $0x4d0] sm:$0xff] %v179_v26  ;;  %v243_v26 = vld [vmem:[#allocation2 + $0x6d0] sm:$0xff] }
  0xa2   :  { %436 = vst [vmem:[#allocation5 + $0x4d8] sm:$0xff] %v180_v27  ;;  %v244_v27 = vld [vmem:[#allocation2 + $0x6d8] sm:$0xff] }
  0xa3   :  { %437 = vst [vmem:[#allocation5 + $0x4e0] sm:$0xff] %v181_v28  ;;  %v245_v28 = vld [vmem:[#allocation2 + $0x6e0] sm:$0xff] }
  0xa4   :  { %438 = vst [vmem:[#allocation5 + $0x4e8] sm:$0xff] %v182_v29  ;;  %v246_v29 = vld [vmem:[#allocation2 + $0x6e8] sm:$0xff] }
  0xa5   :  { %439 = vst [vmem:[#allocation5 + $0x4f0] sm:$0xff] %v183_v30  ;;  %v247_v30 = vld [vmem:[#allocation2 + $0x6f0] sm:$0xff] }
  0xa6   :  { %440 = vst [vmem:[#allocation5 + $0x4f8] sm:$0xff] %v184_v31  ;;  %v248_v31 = vld [vmem:[#allocation2 + $0x6f8] sm:$0xff] }
  0xa7   :  { %441 = vst [vmem:[#allocation5 + $0x500] sm:$0xff] %v185_v32  ;;  %v249_v32 = vld [vmem:[#allocation2 + $0x700] sm:$0xff] }
  0xa8   :  { %442 = vst [vmem:[#allocation5 + $0x508] sm:$0xff] %v186_v33  ;;  %v250_v33 = vld [vmem:[#allocation2 + $0x708] sm:$0xff] }
  0xa9   :  { %443 = vst [vmem:[#allocation5 + $0x510] sm:$0xff] %v187_v34  ;;  %v251_v34 = vld [vmem:[#allocation2 + $0x710] sm:$0xff] }
  0xaa   :  { %444 = vst [vmem:[#allocation5 + $0x518] sm:$0xff] %v188_v35  ;;  %v252_v35 = vld [vmem:[#allocation2 + $0x718] sm:$0xff] }
  0xab   :  { %445 = vst [vmem:[#allocation5 + $0x520] sm:$0xff] %v189_v36  ;;  %v253_v36 = vld [vmem:[#allocation2 + $0x720] sm:$0xff] }
  0xac   :  { %446 = vst [vmem:[#allocation5 + $0x528] sm:$0xff] %v190_v37  ;;  %v254_v37 = vld [vmem:[#allocation2 + $0x728] sm:$0xff] }
  0xad   :  { %447 = vst [vmem:[#allocation5 + $0x530] sm:$0xff] %v191_v38  ;;  %v255_v38 = vld [vmem:[#allocation2 + $0x730] sm:$0xff] }
  0xae   :  { %448 = vst [vmem:[#allocation5 + $0x538] sm:$0xff] %v192_v39  ;;  %v256_v39 = vld [vmem:[#allocation2 + $0x738] sm:$0xff] }
  0xaf   :  { %449 = vst [vmem:[#allocation5 + $0x540] sm:$0xff] %v193_v40  ;;  %v257_v40 = vld [vmem:[#allocation2 + $0x740] sm:$0xff] }
  0xb0   :  { %450 = vst [vmem:[#allocation5 + $0x548] sm:$0xff] %v194_v41  ;;  %v258_v41 = vld [vmem:[#allocation2 + $0x748] sm:$0xff] }
  0xb1   :  { %451 = vst [vmem:[#allocation5 + $0x550] sm:$0xff] %v195_v42  ;;  %v259_v42 = vld [vmem:[#allocation2 + $0x750] sm:$0xff] }
  0xb2   :  { %452 = vst [vmem:[#allocation5 + $0x558] sm:$0xff] %v196_v43  ;;  %v260_v43 = vld [vmem:[#allocation2 + $0x758] sm:$0xff] }
  0xb3   :  { %453 = vst [vmem:[#allocation5 + $0x560] sm:$0xff] %v197_v44  ;;  %v261_v44 = vld [vmem:[#allocation2 + $0x760] sm:$0xff] }
  0xb4   :  { %454 = vst [vmem:[#allocation5 + $0x568] sm:$0xff] %v198_v45  ;;  %v262_v45 = vld [vmem:[#allocation2 + $0x768] sm:$0xff] }
  0xb5   :  { %455 = vst [vmem:[#allocation5 + $0x570] sm:$0xff] %v199_v46  ;;  %v263_v46 = vld [vmem:[#allocation2 + $0x770] sm:$0xff] }
  0xb6   :  { %456 = vst [vmem:[#allocation5 + $0x578] sm:$0xff] %v200_v47  ;;  %v264_v47 = vld [vmem:[#allocation2 + $0x778] sm:$0xff] }
  0xb7   :  { %457 = vst [vmem:[#allocation5 + $0x580] sm:$0xff] %v201_v48  ;;  %v265_v48 = vld [vmem:[#allocation2 + $0x780] sm:$0xff] }
  0xb8   :  { %458 = vst [vmem:[#allocation5 + $0x588] sm:$0xff] %v202_v49  ;;  %v266_v49 = vld [vmem:[#allocation2 + $0x788] sm:$0xff] }
  0xb9   :  { %459 = vst [vmem:[#allocation5 + $0x590] sm:$0xff] %v203_v50  ;;  %v267_v50 = vld [vmem:[#allocation2 + $0x790] sm:$0xff] }
  0xba   :  { %460 = vst [vmem:[#allocation5 + $0x598] sm:$0xff] %v204_v51  ;;  %v268_v51 = vld [vmem:[#allocation2 + $0x798] sm:$0xff] }
  0xbb   :  { %461 = vst [vmem:[#allocation5 + $0x5a0] sm:$0xff] %v205_v52  ;;  %v269_v52 = vld [vmem:[#allocation2 + $0x7a0] sm:$0xff] }
  0xbc   :  { %462 = vst [vmem:[#allocation5 + $0x5a8] sm:$0xff] %v206_v53  ;;  %v270_v53 = vld [vmem:[#allocation2 + $0x7a8] sm:$0xff] }
  0xbd   :  { %463 = vst [vmem:[#allocation5 + $0x5b0] sm:$0xff] %v207_v54  ;;  %v271_v54 = vld [vmem:[#allocation2 + $0x7b0] sm:$0xff] }
  0xbe   :  { %464 = vst [vmem:[#allocation5 + $0x5b8] sm:$0xff] %v208_v55  ;;  %v272_v55 = vld [vmem:[#allocation2 + $0x7b8] sm:$0xff] }
  0xbf   :  { %465 = vst [vmem:[#allocation5 + $0x5c0] sm:$0xff] %v209_v56  ;;  %v273_v56 = vld [vmem:[#allocation2 + $0x7c0] sm:$0xff] }
  0xc0   :  { %466 = vst [vmem:[#allocation5 + $0x5c8] sm:$0xff] %v210_v57  ;;  %v274_v57 = vld [vmem:[#allocation2 + $0x7c8] sm:$0xff] }
  0xc1   :  { %467 = vst [vmem:[#allocation5 + $0x5d0] sm:$0xff] %v211_v58  ;;  %v275_v58 = vld [vmem:[#allocation2 + $0x7d0] sm:$0xff] }
  0xc2   :  { %468 = vst [vmem:[#allocation5 + $0x5d8] sm:$0xff] %v212_v59  ;;  %v276_v59 = vld [vmem:[#allocation2 + $0x7d8] sm:$0xff] }
  0xc3   :  { %469 = vst [vmem:[#allocation5 + $0x5e0] sm:$0xff] %v213_v60  ;;  %v277_v60 = vld [vmem:[#allocation2 + $0x7e0] sm:$0xff] }
  0xc4   :  { %470 = vst [vmem:[#allocation5 + $0x5e8] sm:$0xff] %v214_v61  ;;  %v278_v61 = vld [vmem:[#allocation2 + $0x7e8] sm:$0xff] }
  0xc5   :  { %471 = vst [vmem:[#allocation5 + $0x5f0] sm:$0xff] %v215_v62  ;;  %v279_v62 = vld [vmem:[#allocation2 + $0x7f0] sm:$0xff] }
  0xc6   :  { %472 = vst [vmem:[#allocation5 + $0x5f8] sm:$0xff] %v216_v63  ;;  %v280_v63 = vld [vmem:[#allocation2 + $0x7f8] sm:$0xff] }
  0xc7   :  { %473 = vst [vmem:[#allocation5 + $0x600] sm:$0xff] %v217_v0 }
  0xc8   :  { %474 = vst [vmem:[#allocation5 + $0x608] sm:$0xff] %v218_v1 }
  0xc9   :  { %475 = vst [vmem:[#allocation5 + $0x610] sm:$0xff] %v219_v2 }
  0xca   :  { %476 = vst [vmem:[#allocation5 + $0x618] sm:$0xff] %v220_v3 }
  0xcb   :  { %477 = vst [vmem:[#allocation5 + $0x620] sm:$0xff] %v221_v4 }
  0xcc   :  { %478 = vst [vmem:[#allocation5 + $0x628] sm:$0xff] %v222_v5 }
  0xcd   :  { %479 = vst [vmem:[#allocation5 + $0x630] sm:$0xff] %v223_v6 }
  0xce   :  { %480 = vst [vmem:[#allocation5 + $0x638] sm:$0xff] %v224_v7 }
  0xcf   :  { %481 = vst [vmem:[#allocation5 + $0x640] sm:$0xff] %v225_v8 }
  0xd0   :  { %482 = vst [vmem:[#allocation5 + $0x648] sm:$0xff] %v226_v9 }
  0xd1   :  { %483 = vst [vmem:[#allocation5 + $0x650] sm:$0xff] %v227_v10 }
  0xd2   :  { %484 = vst [vmem:[#allocation5 + $0x658] sm:$0xff] %v228_v11 }
  0xd3   :  { %485 = vst [vmem:[#allocation5 + $0x660] sm:$0xff] %v229_v12 }
  0xd4   :  { %486 = vst [vmem:[#allocation5 + $0x668] sm:$0xff] %v230_v13 }
  0xd5   :  { %487 = vst [vmem:[#allocation5 + $0x670] sm:$0xff] %v231_v14 }
  0xd6   :  { %488 = vst [vmem:[#allocation5 + $0x678] sm:$0xff] %v232_v15 }
  0xd7   :  { %489 = vst [vmem:[#allocation5 + $0x680] sm:$0xff] %v233_v16 }
  0xd8   :  { %490 = vst [vmem:[#allocation5 + $0x688] sm:$0xff] %v234_v17 }
  0xd9   :  { %491 = vst [vmem:[#allocation5 + $0x690] sm:$0xff] %v235_v18 }
  0xda   :  { %492 = vst [vmem:[#allocation5 + $0x698] sm:$0xff] %v236_v19 }
  0xdb   :  { %493 = vst [vmem:[#allocation5 + $0x6a0] sm:$0xff] %v237_v20 }
  0xdc   :  { %494 = vst [vmem:[#allocation5 + $0x6a8] sm:$0xff] %v238_v21 }
  0xdd   :  { %495 = vst [vmem:[#allocation5 + $0x6b0] sm:$0xff] %v239_v22 }
  0xde   :  { %496 = vst [vmem:[#allocation5 + $0x6b8] sm:$0xff] %v240_v23 }
  0xdf   :  { %497 = vst [vmem:[#allocation5 + $0x6c0] sm:$0xff] %v241_v24 }
  0xe0   :  { %498 = vst [vmem:[#allocation5 + $0x6c8] sm:$0xff] %v242_v25 }
  0xe1   :  { %499 = vst [vmem:[#allocation5 + $0x6d0] sm:$0xff] %v243_v26 }
  0xe2   :  { %500 = vst [vmem:[#allocation5 + $0x6d8] sm:$0xff] %v244_v27 }
  0xe3   :  { %501 = vst [vmem:[#allocation5 + $0x6e0] sm:$0xff] %v245_v28 }
  0xe4   :  { %502 = vst [vmem:[#allocation5 + $0x6e8] sm:$0xff] %v246_v29 }
  0xe5   :  { %503 = vst [vmem:[#allocation5 + $0x6f0] sm:$0xff] %v247_v30 }
  0xe6   :  { %504 = vst [vmem:[#allocation5 + $0x6f8] sm:$0xff] %v248_v31 }
  0xe7   :  { %505 = vst [vmem:[#allocation5 + $0x700] sm:$0xff] %v249_v32 }
  0xe8   :  { %506 = vst [vmem:[#allocation5 + $0x708] sm:$0xff] %v250_v33 }
  0xe9   :  { %507 = vst [vmem:[#allocation5 + $0x710] sm:$0xff] %v251_v34 }
  0xea   :  { %508 = vst [vmem:[#allocation5 + $0x718] sm:$0xff] %v252_v35 }
  0xeb   :  { %509 = vst [vmem:[#allocation5 + $0x720] sm:$0xff] %v253_v36 }
  0xec   :  { %510 = vst [vmem:[#allocation5 + $0x728] sm:$0xff] %v254_v37 }
  0xed   :  { %511 = vst [vmem:[#allocation5 + $0x730] sm:$0xff] %v255_v38 }
  0xee   :  { %512 = vst [vmem:[#allocation5 + $0x738] sm:$0xff] %v256_v39 }
  0xef   :  { %513 = vst [vmem:[#allocation5 + $0x740] sm:$0xff] %v257_v40 }
  0xf0   :  { %514 = vst [vmem:[#allocation5 + $0x748] sm:$0xff] %v258_v41 }
  0xf1   :  { %515 = vst [vmem:[#allocation5 + $0x750] sm:$0xff] %v259_v42 }
  0xf2   :  { %516 = vst [vmem:[#allocation5 + $0x758] sm:$0xff] %v260_v43 }
  0xf3   :  { %517 = vst [vmem:[#allocation5 + $0x760] sm:$0xff] %v261_v44 }
  0xf4   :  { %518 = vst [vmem:[#allocation5 + $0x768] sm:$0xff] %v262_v45 }
  0xf5   :  { %519 = vst [vmem:[#allocation5 + $0x770] sm:$0xff] %v263_v46 }
  0xf6   :  { %520 = vst [vmem:[#allocation5 + $0x778] sm:$0xff] %v264_v47 }
  0xf7   :  { %521 = vst [vmem:[#allocation5 + $0x780] sm:$0xff] %v265_v48 }
  0xf8   :  { %522 = vst [vmem:[#allocation5 + $0x788] sm:$0xff] %v266_v49 }
  0xf9   :  { %523 = vst [vmem:[#allocation5 + $0x790] sm:$0xff] %v267_v50 }
  0xfa   :  { %524 = vst [vmem:[#allocation5 + $0x798] sm:$0xff] %v268_v51 }
  0xfb   :  { %525 = vst [vmem:[#allocation5 + $0x7a0] sm:$0xff] %v269_v52 }
  0xfc   :  { %526 = vst [vmem:[#allocation5 + $0x7a8] sm:$0xff] %v270_v53 }
  0xfd   :  { %527 = vst [vmem:[#allocation5 + $0x7b0] sm:$0xff] %v271_v54 }
  0xfe   :  { %528 = vst [vmem:[#allocation5 + $0x7b8] sm:$0xff] %v272_v55 }
  0xff   :  { %529 = vst [vmem:[#allocation5 + $0x7c0] sm:$0xff] %v273_v56 }
 0x100   :  { %530 = vst [vmem:[#allocation5 + $0x7c8] sm:$0xff] %v274_v57 }
 0x101   :  { %531 = vst [vmem:[#allocation5 + $0x7d0] sm:$0xff] %v275_v58 }
 0x102   :  { %532 = vst [vmem:[#allocation5 + $0x7d8] sm:$0xff] %v276_v59 }
 0x103   :  { %533 = vst [vmem:[#allocation5 + $0x7e0] sm:$0xff] %v277_v60 }
 0x104   :  { %534 = vst [vmem:[#allocation5 + $0x7e8] sm:$0xff] %v278_v61 }
 0x105   :  { %535 = vst [vmem:[#allocation5 + $0x7f0] sm:$0xff] %v279_v62 }
 0x106   :  { %536 = vst [vmem:[#allocation5 + $0x7f8] sm:$0xff] %v280_v63 }
 0x107   :  { %549 = dma.vmem_to_hbm [thread:$0]  %s542_s13, 32768, %s544_s16, [#allocation4], %s613_s11, %s613_s11, %s614_s12  }
 0x108   :  { %610 = dma.done.wait [#allocation4], 32768  }
 0x109   :  { %611 = vsyncadd [#allocation4], 4294934528 }
 0x10a   :  { %554 = vsyncpa [#allocation3], 1 }
 0x10b   :  { %555 = vsyncpa [#allocation4], 1 }

</bundles_post_ra>
